<compile_context>
chip_gen: v7x
topology: tpu7x:2x2x1
jax: 0.10.0
libtpu: 0.0.40
codegen_flags: <defaults>
</compile_context>

<pallas_src>
import numpy as np
import jax
import jax.numpy as jnp
from jax.experimental import pallas as pl
from jax.experimental.pallas import tpu as pltpu


def _round_up(x, m):
    return ((x + m - 1) // m) * m


def _make_mean_agg_kernel(max_active, sub_k, n_sub):
    """Builds the kernel closed over static tiling constants."""

    def kernel(tbl_ref, cnt_ref, idx_ref, inv_ref, feat_ref, out_ref):
        # tbl_ref : SMEM i32 [grid_i * max_active]  active feature-tile indices (flat)
        # cnt_ref : SMEM i32 [grid_i]               number of active tiles per node tile
        # idx_ref : VMEM i32 [TILE_N, S]            sampled neighbor rows (-1 = padding)
        # inv_ref : VMEM f32 [TILE_N, 1]            1/num_samples (0 for empty rows)
        # feat_ref: VMEM bf16[TILE_K, D_pad]        active feature-row tile
        # out_ref : VMEM f32 [TILE_N, D_pad]        output block (resident across k)
        i = pl.program_id(0)
        k = pl.program_id(1)
        tile_n, n_samples = idx_ref.shape
        tile_k = feat_ref.shape[0]

        @pl.when(k == 0)
        def _():
            out_ref[...] = jnp.zeros_like(out_ref)

        @pl.when(k < cnt_ref[i])
        def _():
            base = tbl_ref[i * max_active + k] * tile_k
            # Hoist per-sample index columns (static slices) out of the sub-slab loop.
            idx_cols = [idx_ref[:, s:s + 1] for s in range(n_samples)]
            acc = out_ref[...]
            for c in range(n_sub):
                row_ids = (base + c * sub_k
                           + jax.lax.broadcasted_iota(jnp.int32, (1, sub_k), 1))
                # Unweighted match count: cmp + add per sample (sentinel -1 never hits).
                sel = jnp.zeros((tile_n, sub_k), jnp.float32)
                for s in range(n_samples):
                    sel = sel + (idx_cols[s] == row_ids).astype(jnp.float32)
                feat_sub = feat_ref[c * sub_k:(c + 1) * sub_k, :]
                # bf16 MXU matmul, f32 accumulation. Counts <= S are exact in bf16.
                acc = acc + jnp.dot(sel.astype(feat_sub.dtype), feat_sub,
                                    preferred_element_type=jnp.float32)
            out_ref[...] = acc

        @pl.when(k == pl.num_programs(1) - 1)
        def _():
            out_ref[...] = out_ref[...] * inv_ref[...]   # per-node 1/cnt, once

    return kernel


def mean_aggregate_pallas(features, neigh_idx, *, tile_n=128, tile_k=512, sub_k=128):
    """features: f32[N', D]; neigh_idx: i32[n, S] (-1 padded) -> f32[n, D].

    out[i] = mean_s features[neigh_idx[i, s]] over valid (>=0) samples;
    rows with no valid samples come out exactly zero (matches torch.zeros + skip).
    """
    features = jnp.asarray(features)
    neigh_idx = np.asarray(neigh_idx, np.int32)

    n_prime, d = features.shape
    n, s = neigh_idx.shape

    d_pad = _round_up(d, 128)                       # lane-dense feature/output slabs
    tile_n = min(tile_n, _round_up(max(n, 1), 8))
    # feature tile rows: multiple of the MXU sub-slab so the in-kernel loop is exact
    tile_k = min(tile_k, _round_up(max(n_prime, 1), sub_k))

    # Conservative VMEM budget for double-buffered blocks (safe on v5e 16MiB scoped
    # default and v7x 64MiB physical); shrink the feature DMA tile first.
    budget = 12 * 1024 * 1024

    def vmem_est(tk, tn):
        return (2 * tk * d_pad * 2          # bf16 feature tile, double buffered
                + 2 * tn * d_pad * 4        # f32 output block
                + 2 * tn * (s + 1) * 4      # idx + inv blocks
                + tn * (d_pad + sub_k) * 4)  # acc / sel temporaries

    while vmem_est(tile_k, tile_n) > budget and tile_k > sub_k:
        tile_k -= sub_k
    while vmem_est(tile_k, tile_n) > budget and tile_n > 8:
        tile_n //= 2
        tile_n = _round_up(tile_n, 8)

    n_sub = tile_k // sub_k
    n_pad = _round_up(n, tile_n)
    np_pad = _round_up(n_prime, tile_k)
    grid_i = n_pad // tile_n

    # --- host-side padded operands ---------------------------------------------
    feats_p = jnp.zeros((np_pad, d_pad), jnp.bfloat16)
    feats_p = feats_p.at[:n_prime, :d].set(features.astype(jnp.bfloat16))

    idx_p = np.full((n_pad, s), -1, dtype=np.int32)   # sentinel padding (never matches)
    idx_p[:n, :] = neigh_idx
    cnt_valid = (idx_p >= 0).sum(axis=1)
    inv_p = np.zeros((n_pad, 1), dtype=np.float32)
    nz = cnt_valid > 0
    inv_p[nz, 0] = 1.0 / cnt_valid[nz].astype(np.float32)

    # --- per-node-tile active feature-tile table (scalar prefetch) --------------
    active = []
    for t in range(grid_i):
        blk = idx_p[t * tile_n:(t + 1) * tile_n]
        valid = blk[blk >= 0]
        tiles = (np.unique(valid // tile_k) if valid.size
                 else np.zeros((0,), dtype=np.int64))
        active.append(tiles.astype(np.int32))
    max_active = max(1, max((len(a) for a in active), default=1))
    tbl = np.zeros((grid_i, max_active), dtype=np.int32)
    cnt = np.zeros((grid_i,), dtype=np.int32)
    for t, a in enumerate(active):
        cnt[t] = len(a)
        if len(a):
            tbl[t, :len(a)] = a
            tbl[t, len(a):] = a[-1]    # repeat last tile: no re-DMA, compute skipped
    tbl_flat = jnp.asarray(tbl.reshape(-1))            # flat 1D SMEM (avoid 2D padding)
    cnt_j = jnp.asarray(cnt)

    kernel = _make_mean_agg_kernel(max_active, sub_k, n_sub)

    out = pl.pallas_call(
        kernel,
        out_shape=jax.ShapeDtypeStruct((n_pad, d_pad), jnp.float32),
        grid_spec=pltpu.PrefetchScalarGridSpec(
            num_scalar_prefetch=2,
            grid=(grid_i, max_active),
            in_specs=[
                pl.BlockSpec((tile_n, s), lambda i, k, tbl, cnt: (i, 0)),       # indices
                pl.BlockSpec((tile_n, 1), lambda i, k, tbl, cnt: (i, 0)),       # 1/cnt
                pl.BlockSpec((tile_k, d_pad),                                   # features
                             lambda i, k, tbl, cnt: (tbl[i * max_active + k], 0)),
            ],
            out_specs=pl.BlockSpec((tile_n, d_pad), lambda i, k, tbl, cnt: (i, 0)),
        ),
        compiler_params=pltpu.CompilerParams(
            dimension_semantics=("parallel", "arbitrary"),
            vmem_limit_bytes=32 * 1024 * 1024,
        ),
    )(tbl_flat, cnt_j, jnp.asarray(idx_p), jnp.asarray(inv_p), feats_p)

    return out[:n, :d].astype(features.dtype)


class Aggregator:
    """JAX/Pallas port of models/graphsage/aggregators.py::Aggregator (mean variant)."""

    def __init__(self, input_dim=None, output_dim=None):
        self.input_dim = input_dim
        self.output_dim = output_dim
        self._last_sampled = None

    def forward(self, features, nodes, mapping, rows, num_samples=25):
        # ---- host-side glue: identical sampling logic to the PyTorch module ----
        _choice, _len, _min = (np.random.choice, len, min)
        mapped_rows = [np.array([mapping[v] for v in row], dtype=np.int64) for row in rows]
        if num_samples == -1:
            sampled_rows = mapped_rows
        else:
            sampled_rows = [
                _choice(row, _min(_len(row), num_samples), _len(row) < num_samples)
                if _len(row) > 0 else row
                for row in mapped_rows
            ]

        n = _len(nodes)
        n_prime = int(features.shape[0])

        # rectangular [n, S] index table; padded slots use sentinel -1
        max_s = max(1, max((_len(r) for r in sampled_rows), default=1))
        idx = np.full((n, max_s), -1, dtype=np.int32)
        for i, r in enumerate(sampled_rows):
            c = _len(r)
            if c > 0:
                ri = np.asarray(r, dtype=np.int32)
                assert np.all((ri >= 0) & (ri < n_prime)), "neighbor index out of range"
                idx[i, :c] = ri

        self._last_sampled = [np.asarray(r, dtype=np.int64) for r in sampled_rows]

        # ---- hot path: count-based one-hot gather + mean via bf16 MXU matmul ----
        return mean_aggregate_pallas(features, idx)


if __name__ == "__main__":
    np.random.seed(0)
    key = jax.random.PRNGKey(0)

    n_prime, hidden = 20, 32            # input_dim == output_dim (mean aggregation)
    features = jax.random.normal(key, (n_prime, hidden), dtype=jnp.float32)

    nodes = np.arange(6)
    mapping = {v: v for v in range(n_prime)}          # node id -> row in `features`
    rows = [
        np.array([1, 2, 3, 4, 5, 6, 7], dtype=np.int64),
        np.array([0, 2], dtype=np.int64),
        np.array([10, 11, 12, 13, 14, 15], dtype=np.int64),
        np.array([], dtype=np.int64),                  # isolated node -> zero row
        np.array([19], dtype=np.int64),
        np.array([3, 8, 9, 16, 17, 18, 4, 5], dtype=np.int64),
    ]
    num_samples = 5

    agg = Aggregator(input_dim=hidden, output_dim=hidden)
    out = agg.forward(features, nodes, mapping, rows, num_samples=num_samples)
    out = jax.block_until_ready(out)

    # Reference built from the exact sampled indices the wrapper used.  The kernel
    # streams features as bf16 (f32 accumulation), so the reference uses
    # bf16-rounded features too.
    f_bf = np.asarray(features.astype(jnp.bfloat16).astype(jnp.float32))
    ref = np.zeros((len(nodes), hidden), dtype=np.float32)
    for i, r in enumerate(agg._last_sampled):
        if len(r) > 0:
            ref[i, :] = f_bf[r, :].sum(axis=0) / float(len(r))

    np.testing.assert_allclose(np.asarray(out), ref, rtol=1e-5, atol=1e-5)
    print("KERNEL_OK")
</pallas_src>

<mosaic_0001>
module attributes {stable_mosaic.version = 11 : i64} {
  func.func @kernel(%arg0: i32, %arg1: i32, %arg2: memref<1xi32, #tpu.memory_space<smem>>, %arg3: memref<1xi32, #tpu.memory_space<smem>>, %arg4: memref<8x5xi32, #tpu.memory_space<vmem>>, %arg5: memref<8x1xf32, #tpu.memory_space<vmem>>, %arg6: memref<128x128xbf16, #tpu.memory_space<vmem>>, %arg7: memref<8x128xf32, #tpu.memory_space<vmem>>) attributes {dimension_semantics = [#tpu.dimension_semantics<parallel>, #tpu.dimension_semantics<arbitrary>], iteration_bounds = array<i64: 1, 1>, scalar_prefetch = 2 : i64, scratch_operands = 0 : i64, tpu.core_type = #tpu.core_type<tc>, window_params = [{transform_indices = @transform_0, window_bounds = array<i64: 8, 5>}, {transform_indices = @transform_1, window_bounds = array<i64: 8, 1>}, {transform_indices = @transform_2, window_bounds = array<i64: 128, 128>}, {transform_indices = @transform_3, window_bounds = array<i64: 8, 128>}]} {
    %c0_i32 = arith.constant 0 : i32
    %0 = arith.cmpi eq, %arg1, %c0_i32 : i32
    %1 = arith.extui %0 : i1 to i32
    %c0_i32_0 = arith.constant 0 : i32
    %2 = arith.cmpi ne, %1, %c0_i32_0 : i32
    scf.if %2 {
      %cst = arith.constant 0.000000e+00 : f32
      %11 = vector.broadcast %cst : f32 to vector<8x128xf32>
      %c0 = arith.constant 0 : index
      %c0_4 = arith.constant 0 : index
      %12 = vector.load %arg7[%c0, %c0_4] : memref<8x128xf32, #tpu.memory_space<vmem>>, vector<8x128xf32>
      tpu.vector_store %arg7[%c0, %c0_4], %11 {strides = array<i32>} : memref<8x128xf32, #tpu.memory_space<vmem>>, vector<8x128xf32>,
    } else {
    }
    %3 = arith.index_cast %arg0 : i32 to index
    %4 = memref.load %arg3[%3] : memref<1xi32, #tpu.memory_space<smem>>
    %5 = arith.cmpi slt, %arg1, %4 : i32
    %6 = arith.extui %5 : i1 to i32
    %c0_i32_1 = arith.constant 0 : i32
    %7 = arith.cmpi ne, %6, %c0_i32_1 : i32
    scf.if %7 {
      %c1_i32 = arith.constant 1 : i32
      %11 = arith.muli %arg0, %c1_i32 : i32
      %12 = arith.addi %11, %arg1 : i32
      %13 = arith.index_cast %12 : i32 to index
      %14 = memref.load %arg2[%13] : memref<1xi32, #tpu.memory_space<smem>>
      %c128_i32 = arith.constant 128 : i32
      %15 = arith.muli %14, %c128_i32 : i32
      %c0 = arith.constant 0 : index
      %c0_4 = arith.constant 0 : index
      %16 = vector.load %arg4[%c0, %c0_4] : memref<8x5xi32, #tpu.memory_space<vmem>>, vector<8x1xi32>
      %c0_5 = arith.constant 0 : index
      %c1 = arith.constant 1 : index
      %17 = vector.load %arg4[%c0_5, %c1] : memref<8x5xi32, #tpu.memory_space<vmem>>, vector<8x1xi32>
      %c0_6 = arith.constant 0 : index
      %c2 = arith.constant 2 : index
      %18 = vector.load %arg4[%c0_6, %c2] : memref<8x5xi32, #tpu.memory_space<vmem>>, vector<8x1xi32>
      %c0_7 = arith.constant 0 : index
      %c3 = arith.constant 3 : index
      %19 = vector.load %arg4[%c0_7, %c3] : memref<8x5xi32, #tpu.memory_space<vmem>>, vector<8x1xi32>
      %c0_8 = arith.constant 0 : index
      %c4 = arith.constant 4 : index
      %20 = vector.load %arg4[%c0_8, %c4] : memref<8x5xi32, #tpu.memory_space<vmem>>, vector<8x1xi32>
      %c0_9 = arith.constant 0 : index
      %c0_10 = arith.constant 0 : index
      %21 = vector.load %arg7[%c0_9, %c0_10] : memref<8x128xf32, #tpu.memory_space<vmem>>, vector<8x128xf32>
      %c0_i32_11 = arith.constant 0 : i32
      %22 = arith.addi %15, %c0_i32_11 : i32
      %23 = tpu.iota {dimensions = array<i32: 1>} : vector<1x128xi32>
      %24 = vector.broadcast %22 : i32 to vector<1x128xi32>
      %25 = arith.addi %24, %23 : vector<1x128xi32>
      %cst = arith.constant 0.000000e+00 : f32
      %26 = vector.broadcast %cst : f32 to vector<8x128xf32>
      %27 = vector.broadcast %16 : vector<8x1xi32> to vector<8x128xi32>
      %28 = vector.broadcast %25 : vector<1x128xi32> to vector<8x128xi32>
      %29 = arith.cmpi eq, %27, %28 : vector<8x128xi32>
      %30 = arith.extui %29 : vector<8x128xi1> to vector<8x128xi32>
      %31 = arith.sitofp %30 : vector<8x128xi32> to vector<8x128xf32>
      %32 = arith.addf %26, %31 : vector<8x128xf32>
      %33 = vector.broadcast %17 : vector<8x1xi32> to vector<8x128xi32>
      %34 = vector.broadcast %25 : vector<1x128xi32> to vector<8x128xi32>
      %35 = arith.cmpi eq, %33, %34 : vector<8x128xi32>
      %36 = arith.extui %35 : vector<8x128xi1> to vector<8x128xi32>
      %37 = arith.sitofp %36 : vector<8x128xi32> to vector<8x128xf32>
      %38 = arith.addf %32, %37 : vector<8x128xf32>
      %39 = vector.broadcast %18 : vector<8x1xi32> to vector<8x128xi32>
      %40 = vector.broadcast %25 : vector<1x128xi32> to vector<8x128xi32>
      %41 = arith.cmpi eq, %39, %40 : vector<8x128xi32>
      %42 = arith.extui %41 : vector<8x128xi1> to vector<8x128xi32>
      %43 = arith.sitofp %42 : vector<8x128xi32> to vector<8x128xf32>
      %44 = arith.addf %38, %43 : vector<8x128xf32>
      %45 = vector.broadcast %19 : vector<8x1xi32> to vector<8x128xi32>
      %46 = vector.broadcast %25 : vector<1x128xi32> to vector<8x128xi32>
      %47 = arith.cmpi eq, %45, %46 : vector<8x128xi32>
      %48 = arith.extui %47 : vector<8x128xi1> to vector<8x128xi32>
      %49 = arith.sitofp %48 : vector<8x128xi32> to vector<8x128xf32>
      %50 = arith.addf %44, %49 : vector<8x128xf32>
      %51 = vector.broadcast %20 : vector<8x1xi32> to vector<8x128xi32>
      %52 = vector.broadcast %25 : vector<1x128xi32> to vector<8x128xi32>
      %53 = arith.cmpi eq, %51, %52 : vector<8x128xi32>
      %54 = arith.extui %53 : vector<8x128xi1> to vector<8x128xi32>
      %55 = arith.sitofp %54 : vector<8x128xi32> to vector<8x128xf32>
      %56 = arith.addf %50, %55 : vector<8x128xf32>
      %c0_12 = arith.constant 0 : index
      %c0_13 = arith.constant 0 : index
      %57 = vector.load %arg6[%c0_12, %c0_13] : memref<128x128xbf16, #tpu.memory_space<vmem>>, vector<128x128xbf16>
      %58 = arith.truncf %56 : vector<8x128xf32> to vector<8x128xbf16>
      %cst_14 = arith.constant dense<0.000000e+00> : vector<8x128xf32>
      %59 = tpu.matmul %58, %57, %cst_14 {dimension_numbers = #tpu.dot_dimension_numbers<[1], [0], [0], [1], [0, 0, 1, 1], [], []>} : vector<8x128xbf16>, vector<128x128xbf16>, vector<8x128xf32> -> vector<8x128xf32>
      %60 = arith.addf %21, %59 : vector<8x128xf32>
      %c0_15 = arith.constant 0 : index
      %c0_16 = arith.constant 0 : index
      %61 = vector.load %arg7[%c0_15, %c0_16] : memref<8x128xf32, #tpu.memory_space<vmem>>, vector<8x128xf32>
      tpu.vector_store %arg7[%c0_15, %c0_16], %60 {strides = array<i32>} : memref<8x128xf32, #tpu.memory_space<vmem>>, vector<8x128xf32>,
    } else {
    }
    %c0_i32_2 = arith.constant 0 : i32
    %8 = arith.cmpi eq, %arg1, %c0_i32_2 : i32
    %9 = arith.extui %8 : i1 to i32
    %c0_i32_3 = arith.constant 0 : i32
    %10 = arith.cmpi ne, %9, %c0_i32_3 : i32
    scf.if %10 {
      %c0 = arith.constant 0 : index
      %c0_4 = arith.constant 0 : index
      %11 = vector.load %arg7[%c0, %c0_4] : memref<8x128xf32, #tpu.memory_space<vmem>>, vector<8x128xf32>
      %c0_5 = arith.constant 0 : index
      %c0_6 = arith.constant 0 : index
      %12 = vector.load %arg5[%c0_5, %c0_6] : memref<8x1xf32, #tpu.memory_space<vmem>>, vector<8x1xf32>
      %13 = vector.broadcast %12 : vector<8x1xf32> to vector<8x128xf32>
      %14 = arith.mulf %11, %13 : vector<8x128xf32>
      %c0_7 = arith.constant 0 : index
      %c0_8 = arith.constant 0 : index
      %15 = vector.load %arg7[%c0_7, %c0_8] : memref<8x128xf32, #tpu.memory_space<vmem>>, vector<8x128xf32>
      tpu.vector_store %arg7[%c0_7, %c0_8], %14 {strides = array<i32>} : memref<8x128xf32, #tpu.memory_space<vmem>>, vector<8x128xf32>,
    } else {
    }
    return
  }
  func.func @transform_0(%arg0: i32, %arg1: i32, %arg2: memref<1xi32, #tpu.memory_space<smem>>, %arg3: memref<1xi32, #tpu.memory_space<smem>>) -> (i32, i32) {
    %c0_i32 = arith.constant 0 : i32
    %c0_i32_0 = arith.constant 0 : i32
    return %arg0, %c0_i32 : i32, i32
  }
  func.func @transform_1(%arg0: i32, %arg1: i32, %arg2: memref<1xi32, #tpu.memory_space<smem>>, %arg3: memref<1xi32, #tpu.memory_space<smem>>) -> (i32, i32) {
    %c0_i32 = arith.constant 0 : i32
    %c0_i32_0 = arith.constant 0 : i32
    return %arg0, %c0_i32 : i32, i32
  }
  func.func @transform_2(%arg0: i32, %arg1: i32, %arg2: memref<1xi32, #tpu.memory_space<smem>>, %arg3: memref<1xi32, #tpu.memory_space<smem>>) -> (i32, i32) {
    %c1_i32 = arith.constant 1 : i32
    %0 = arith.muli %arg0, %c1_i32 : i32
    %1 = arith.addi %0, %arg1 : i32
    %2 = arith.index_cast %1 : i32 to index
    %3 = memref.load %arg2[%2] : memref<1xi32, #tpu.memory_space<smem>>
    %c0_i32 = arith.constant 0 : i32
    %c0_i32_0 = arith.constant 0 : i32
    return %3, %c0_i32 : i32, i32
  }
  func.func @transform_3(%arg0: i32, %arg1: i32, %arg2: memref<1xi32, #tpu.memory_space<smem>>, %arg3: memref<1xi32, #tpu.memory_space<smem>>) -> (i32, i32) {
    %c0_i32 = arith.constant 0 : i32
    %c0_i32_0 = arith.constant 0 : i32
    return %arg0, %c0_i32 : i32, i32
  }
}

</mosaic_0001>

<bundles_post_ra>
// kernel: tpu_custom_call.1
= control target key start
LH: loop header
LB: loop body
LE: loop exit
PB: predicated region body
PF: predicated region fallthrough
CT: control target
= control target key end

     0   :  { %s434_s0 = inlined_call_operand.<no memory space> [shape: s32[1], index: 0, kind: input, shape index: {}]   ;;  %s435_s1 = inlined_call_operand.<no memory space> [shape: s32[1], index: 1, kind: input, shape index: {}]   ;;  %s436_s2 = inlined_call_operand.vmem [shape: s32[8,5], index: 2, kind: input, shape index: {}]   ;;  %s437_s3 = inlined_call_operand.vmem [shape: f32[8,1], index: 3, kind: input, shape index: {}]   ;;  %s438_s4 = inlined_call_operand.hbm [shape: bf16[128,128], index: 4, kind: input, shape index: {}]   ;;  %s439_s5 = inlined_call_operand.hbm [shape: f32[8,128], index: 5, kind: output, shape index: {}]  }
   0x1   :  { %10 = sst [smem:[#allocation3]] %s434_s0 }
   0x2   :  { %12 = vsyncpa [#allocation6], 0 }
   0x3   :  { %13 = vsyncpa [#allocation7], 0  ;;  %s21_s20 = sld [smem:[#allocation3]]  ;;  %s358_s21 = smov [#allocation5]  }
   0x4   :  { %s28_s22 = sshll.u32 %s358_s21, 4  ;;  %s310_s30 = scalar_lea.hbm %s438_s4, 1024  ;;  %s29_s22 = int_to_ptr.vmem [resolvable:$true] %s28_s22 }
   0x9   :  { %s250_s23 = sshll.u32 %s21_s20, 10 }
   0xa   :  { %s27_s26 = scalar_lea.hbm %s438_s4, %s250_s23 }
   0xb   :  { %s308_s27 = scalar_lea.hbm %s27_s26, 1024  ;;  %p311_p1 = scmp.lt.u32.totalorder %s27_s26, %s438_s4 }
   0xc   :  { %p309_p0 = scmp.ne.s32.totalorder %s27_s26, %s308_s27  ;;  %p312_p2 = scmp.lt.u32.totalorder %s310_s30, %s308_s27 }
   0xd   :  { %p314_p4 = scmp.lt.u32.totalorder %s308_s27, %s27_s26 }
   0xe   :  { %p313_p3 = por %p312_p2, %p311_p1 }
  0x10   :  { %p315_p5 = por %p314_p4, %p313_p3 }
  0x12   :  { %p316_p6 = pnand %p315_p5, %p309_p0 }
  0x14   :  { %319 = shalt.err (!%p316_p6)
}
  0x15   :  { %s320_s0 = scalar_lea.vmem %s29_s22, 1024  ;;  %p325_p8 = scmp.lt.s32.totalorder %s29_s22, %s29_s22 }
  0x16   :  { %p321_p7 = scmp.ne.s32.totalorder %s29_s22, %s320_s0  ;;  %p326_p9 = scmp.lt.s32.totalorder %s320_s0, %s320_s0 }
  0x18   :  { %p327_p10 = por %p326_p9, %p325_p8 }
  0x1a   :  { %p328_p11 = pnand %p327_p10, %p321_p7 }
  0x1c   :  { %331 = shalt.err (!%p328_p11)
}
  0x1d   :  { %s359_s8 = smov 64   ;;  %s360_s9 = smov 4  }
  0x1e   :  { %34 = dma.hbm_to_vmem [thread:$0]  %s27_s26, 1024, %s29_s22, [#allocation6], %s359_s8, %s359_s8, %s360_s9  }
  0x1f   :  { %354 = dma.done.wait [#allocation6], 1024  }
  0x20   :  { %355 = vsyncadd [#allocation6], 4294966272  ;;  %v361_v0 = vmov 0.0   ;;  %p235_p12 = scmp.le.s32.totalorder %s435_s1, 0 }
  0x21   :  { %46 = vst [vmem:[#allocation8] sm:$0xff] %v361_v0  ;;  %v55_v1 = vld [vmem:[%s436_s2] sm:$0xff] (!%p235_p12)  ;;  %v362_v3 = vmov (!%p235_p12), 0   ;;  %v363_v4 = vmov (!%p235_p12), 2   ;;  %v364_v5 = vmov (!%p235_p12), 0.0   ;;  %v300_v6 = vld [vmem:[#allocation5 + $0x8] sm:$0xff] (!%p235_p12)   ;;  %v57_v16 = vlaneseq (!%p235_p12) }
  0x22   :  { %51 = sbr.rel (%p235_p12) target bundleno = 395 (0x18b), region = 25  ;;  %v299_v2 = vld [vmem:[#allocation5] sm:$0xff] (!%p235_p12)   ;;  %293 = vset.pattern.permute.xlu0 (!%p235_p12), %v362_v3  ;;  %295 = vset.pattern.permute.xlu1 (!%p235_p12), %v363_v4  ;;  %v365_v7 = vmov (!%p235_p12), 1   ;;  %v366_v8 = vmov (!%p235_p12), 3   ;;  %v301_v9 = vld [vmem:[#allocation5 + $0x10] sm:$0xff] (!%p235_p12)   ;;  %v367_v10 = vmov (!%p235_p12), 4  }
  0x23   :  { %62 = vperm.xlu0 (!%p235_p12), %293, %v55_v1   ;;  %76 = vperm.xlu1 (!%p235_p12), %295, %v55_v1   ;;  %v302_v11 = vld [vmem:[#allocation5 + $0x18] sm:$0xff] (!%p235_p12)   ;;  %v303_v12 = vld [vmem:[#allocation5 + $0x20] sm:$0xff] (!%p235_p12)   ;;  %vm368_vm0 = vmmov (!%p235_p12), 0   ;;  %v304_v13 = vld [vmem:[#allocation5 + $0x28] sm:$0xff] (!%p235_p12)   ;;  %s53_s1 = sld [smem:[#allocation3]] (!%p235_p12)  ;;  %v58_v17 = vand.u32 (!%p235_p12), 127, %v57_v16 }
  0x24   :  { %260 = vmatprep.subr.bf16.mxu0 (!%p235_p12), %v364_v5  ;;  %276 = vmatprep.mubr.msk.bf16.mxu0 (!%p235_p12), %vm368_vm0, %v364_v5  ;;  %v305_v14 = vld [vmem:[#allocation5 + $0x30] sm:$0xff] (!%p235_p12)   ;;  %v306_v15 = vld [vmem:[#allocation5 + $0x38] sm:$0xff] (!%p235_p12)  }
  0x25   :  { %261 = vmatpush3.bf16.msra.mxu0 (!%p235_p12), %v299_v2 }
  0x26   :  { %262 = vmatprep.subr.bf16.mxu0 (!%p235_p12), %v364_v5 }
  0x27   :  { %294 = vset.pattern.permute.xlu0 (!%p235_p12), %v365_v7  ;;  %296 = vset.pattern.permute.xlu1 (!%p235_p12), %v366_v8 }
  0x28   :  { %69 = vperm.xlu0 (!%p235_p12), %294, %v55_v1   ;;  %83 = vperm.xlu1 (!%p235_p12), %296, %v55_v1   ;;  %v56_v35 = vld [vmem:[#allocation8] sm:$0xff] (!%p235_p12) }
  0x29   :  { %263 = vmatpush3.bf16.msra.mxu0 %v300_v6  ;;  %s236_s2 = sshll.u32 %s53_s1, 7 }
  0x2a   :  { %264 = vmatprep.subr.bf16.mxu0 %v364_v5  ;;  %v59_v18 = vstv %s236_s2 }
  0x2b   :  { %v60_v20 = vadd.s32 %v59_v18, %v58_v17 }
  0x2c   :  { %297 = vset.pattern.permute.xlu1 %v367_v10  ;;  %298 = vset.pattern.permute.xlu0 %v367_v10 }
  0x2d   :  { %90 = vperm.xlu1 %297, %v55_v1   ;;  %265 = vmatpush3.bf16.msra.mxu0 %v301_v9 }
  0x2e   :  { %266 = vmatprep.subr.bf16.mxu0 %v364_v5 }
  0x31   :  { %267 = vmatpush3.bf16.msra.mxu0 %v302_v11 }
  0x32   :  { %268 = vmatprep.subr.bf16.mxu0 %v364_v5 }
  0x35   :  { %269 = vmatpush3.bf16.msra.mxu0 %v303_v12 }
  0x36   :  { %270 = vmatprep.subr.bf16.mxu0 %v364_v5 }
  0x39   :  { %271 = vmatpush3.bf16.msra.mxu0 %v304_v13 }
  0x3a   :  { %272 = vmatprep.subr.bf16.mxu0 %v364_v5 }
  0x3d   :  { %273 = vmatpush3.bf16.msra.mxu0 %v305_v14 }
  0x3e   :  { %274 = vmatprep.subr.bf16.mxu0 %v364_v5 }
  0x41   :  { %275 = vmatpush3.bf16.msra.mxu0 %v306_v15 }
  0xa2   :  { %v63_v19 = vpop.permute.xlu0 %62  ;;  %v77_v21 = vpop.permute.xlu1 %76 }
  0xa3   :  { %vm64_vm1 = vcmp.eq.s32.totalorder %v63_v19, %v60_v20  ;;  %vm78_vm2 = vcmp.eq.s32.totalorder %v77_v21, %v60_v20 }
  0xa4   :  { %v237_v24 = vsel %vm64_vm1, 1.0, %v364_v5  ;;  %v239_v27 = vsel %vm78_vm2, 1.0, %v364_v5 }
  0xa7   :  { %v70_v22 = vpop.permute.xlu0 %69  ;;  %v84_v23 = vpop.permute.xlu1 %83 }
  0xa8   :  { %vm71_vm3 = vcmp.eq.s32.totalorder %v70_v22, %v60_v20  ;;  %vm85_vm4 = vcmp.eq.s32.totalorder %v84_v23, %v60_v20 }
  0xa9   :  { %v238_v25 = vsel %vm71_vm3, 1.0, %v364_v5  ;;  %v240_v30 = vsel %vm85_vm4, 1.0, %v364_v5 }
  0xaa   :  { %v74_v26 = vadd.f32 %v238_v25, %v237_v24 }
  0xac   :  { %v81_v28 = vadd.f32 %v239_v27, %v74_v26  ;;  %v91_v29 = vpop.permute.xlu1 %90 }
  0xad   :  { %vm92_vm5 = vcmp.eq.s32.totalorder %v91_v29, %v60_v20 }
  0xae   :  { %v88_v31 = vadd.f32 %v240_v30, %v81_v28  ;;  %v241_v32 = vsel %vm92_vm5, 1.0, %v364_v5 }
  0xb0   :  { %v95_v33 = vadd.f32 %v241_v32, %v88_v31 }
  0xb2   :  { %v112_v34 = vpack.c.bf16 %v95_v33, %v95_v33 }
  0xb4   :  { %277 = vmatmul.mubr.bf16.vlgmr.msra.gmra.mrb[0].mxu0 %v112_v34 }
 0x187   :  { %v195_v36 = vpop.f32.mrb[0].mxu0 }
 0x188   :  { %v201_v37 = vadd.f32 %v195_v36, %v56_v35  ;;  %v278_v38 = vpop.f32.mrb[1].mxu0 }
 0x189   :  { %v198_v39 = vpop.f32.mrb[2].mxu0 }
 0x18a   :  { %202 = vst [vmem:[#allocation8] sm:$0xff] %v201_v37  ;;  %v279_v40 = vpop.f32.mrb[3].mxu0 }
 0x18b PF:  { %v207_v41 = vld [vmem:[%s437_s3] sm:$0xff]  ;;  %v369_v42 = vmov 0   ;;  %s370_s15 = smov [#allocation8]  }
 0x18c   :  { %307 = vset.pattern.permute.xlu0 %v369_v42  ;;  %s221_s16 = sshll.u32 %s370_s15, 4  ;;  %s222_s16 = int_to_ptr.vmem [resolvable:$true] %s221_s16 }
 0x18d   :  { %210 = vperm.xlu0 %307, %v207_v41   ;;  %s332_s17 = scalar_lea.vmem %s222_s16, 128  ;;  %p337_p0 = scmp.lt.s32.totalorder %s222_s16, %s222_s16 }
 0x18e   :  { %p333_p13 = scmp.ne.s32.totalorder %s222_s16, %s332_s17  ;;  %p338_p1 = scmp.lt.s32.totalorder %s332_s17, %s332_s17 }
 0x190   :  { %p339_p2 = por %p338_p1, %p337_p0 }
 0x191   :  { %v206_v43 = vld [vmem:[#allocation8] sm:$0xff] }
 0x192   :  { %p340_p3 = pnand %p339_p2, %p333_p13 }
 0x20c   :  { %v211_v44 = vpop.permute.xlu0 %210 }
 0x20d   :  { %v213_v45 = vmul.f32 %v211_v44, %v206_v43 }
 0x20f   :  { %214 = vst [vmem:[#allocation8] sm:$0xff] %v213_v45 }
 0x210   :  { %343 = shalt.err (!%p340_p3)
}
 0x211   :  { %s344_s3 = scalar_lea.hbm %s439_s5, 128 }
 0x212   :  { %p345_p4 = scmp.ne.s32.totalorder %s439_s5, %s344_s3  ;;  %p348_p5 = scmp.lt.u32.totalorder %s344_s3, %s439_s5 }
 0x214   :  { %p350_p6 = pnand %p348_p5, %p345_p4 }
 0x216   :  { %353 = shalt.err (!%p350_p6)
}
 0x217   :  { %224 = dma.vmem_to_hbm [thread:$0]  %s222_s16, 128, %s439_s5, [#allocation7]  }
 0x218   :  { %356 = dma.done.wait [#allocation7], 128  }
 0x219   :  { %357 = vsyncadd [#allocation7], 4294967168 }
 0x21a   :  { %228 = vsyncpa [#allocation6], 1 }
 0x21b   :  { %229 = vsyncpa [#allocation7], 1 }

</bundles_post_ra>
